<compile_context>
chip_gen: v7x
topology: tpu7x:2x2x1
jax: 0.10.0
libtpu: 0.0.40
codegen_flags: <defaults>
</compile_context>

<pallas_src>
import functools

import jax
import jax.numpy as jnp
import numpy as np
from jax.experimental import pallas as pl
from jax.experimental.pallas import tpu as pltpu


def _round_up(x, m):
    return (x + m - 1) // m * m


# Padded per-head hidden sizes (lane-aligned).
H1P = 128            # per-head hidden-1: 100 -> 128
H2P = 64             # per-head hidden-2: 30  -> 64
H1T = 2 * H1P        # fused hidden-1 width = 256 lanes
H2T = 2 * H2P        # fused hidden-2 width = 128 lanes
WSLAB = H1T          # slab lane width = 256


def fuse_critic_params(params, state_dim, action_dim):
    """Fold the 6 Linear layers into one pre-padded f32 slab [n_rows, 256].

    params: [(w1,b1), ..., (w6,b6)] with weights stored [in, out]
            (transposed vs. PyTorch so y = x @ W + b == nn.Linear(x)).

    Slab row layout (all offsets 8-row aligned):
      rows [r_w14, r_w14+in_pad) : W14 [in_pad, 256]   layer1|layer4, lane-padded
      row   r_b14                : b14 [1, 256]
      rows [r_w25, r_w25+256)    : W25 [256, 128] in cols 0:128 (block-diag l2|l5)
      row   r_b25                : b25 [1, 128]   in cols 0:128
      rows [r_w36, r_w36+128)    : W36 [128, 128] only cols 0:2 nonzero (l3|l6)
      row   r_b36                : b36 [1, 2]     in cols 0:2
    """
    (w1, b1), (w2, b2), (w3, b3), (w4, b4), (w5, b5), (w6, b6) = params
    in_dim = state_dim + action_dim
    h1 = w1.shape[1]          # 100
    h2 = w2.shape[1]          # 30
    in_pad = _round_up(in_dim, 8)

    r_w14 = 0
    r_b14 = r_w14 + in_pad
    r_w25 = r_b14 + 8
    r_b25 = r_w25 + H1T
    r_w36 = r_b25 + 8
    r_b36 = r_w36 + H2T
    n_rows = r_b36 + 8

    slab = jnp.zeros((n_rows, WSLAB), jnp.float32)

    # Layer 1 / 4: head1 -> cols 0:h1, head2 -> cols H1P:H1P+h1.
    slab = slab.at[r_w14:r_w14 + in_dim, 0:h1].set(w1.astype(jnp.float32))
    slab = slab.at[r_w14:r_w14 + in_dim, H1P:H1P + h1].set(w4.astype(jnp.float32))
    slab = slab.at[r_b14, 0:h1].set(b1.astype(jnp.float32))
    slab = slab.at[r_b14, H1P:H1P + h1].set(b4.astype(jnp.float32))

    # Layer 2 / 5: block-diagonal in cols 0:128.
    slab = slab.at[r_w25:r_w25 + h1, 0:h2].set(w2.astype(jnp.float32))
    slab = slab.at[r_w25 + H1P:r_w25 + H1P + h1, H2P:H2P + h2].set(w5.astype(jnp.float32))
    slab = slab.at[r_b25, 0:h2].set(b2.astype(jnp.float32))
    slab = slab.at[r_b25, H2P:H2P + h2].set(b5.astype(jnp.float32))

    # Layer 3 / 6: Q1 -> col 0, Q2 -> col 1.
    slab = slab.at[r_w36:r_w36 + h2, 0].set(w3[:, 0].astype(jnp.float32))
    slab = slab.at[r_w36 + H2P:r_w36 + H2P + h2, 1].set(w6[:, 0].astype(jnp.float32))
    slab = slab.at[r_b36, 0].set(b3[0].astype(jnp.float32))
    slab = slab.at[r_b36, 1].set(b6[0].astype(jnp.float32))

    layout = dict(in_pad=in_pad, r_w14=r_w14, r_b14=r_b14, r_w25=r_w25,
                  r_b25=r_b25, r_w36=r_w36, r_b36=r_b36, n_rows=n_rows)
    return slab, layout


def _critic_kernel(xu_ref, w_ref, q_ref, *, in_pad, r_w14, r_b14, r_w25,
                   r_b25, r_w36, r_b36):
    # Layer 1 (both heads, 256 lanes): h = relu(xu @ W14 + b14)        [TB, 256]
    h = jnp.dot(xu_ref[...], w_ref[r_w14:r_w14 + in_pad, :],
                preferred_element_type=jnp.float32)
    h = jnp.maximum(h + w_ref[r_b14:r_b14 + 1, :], 0.0)

    # Layer 2 (block-diagonal, 128 lanes): g = relu(h @ W25 + b25)     [TB, 128]
    g = jnp.dot(h, w_ref[r_w25:r_w25 + H1T, 0:H2T],
                preferred_element_type=jnp.float32)
    g = jnp.maximum(g + w_ref[r_b25:r_b25 + 1, 0:H2T], 0.0)

    # Layer 3: clean 128-wide matmul (cols 2:128 are zero), slice the value.
    q = jnp.dot(g, w_ref[r_w36:r_w36 + H2T, 0:H2T],
                preferred_element_type=jnp.float32)
    q = q + w_ref[r_b36:r_b36 + 1, 0:H2T]
    q_ref[...] = q[:, 0:2]                       # col 0 = Q1, col 1 = Q2


def critic_forward(x, u, fused):
    """x: [B, state_dim], u: [B, action_dim] -> (q1 [B,1], q2 [B,1])."""
    slab, layout = fused
    B = x.shape[0]
    in_dim = x.shape[1] + u.shape[1]
    in_pad = layout["in_pad"]
    n_rows = layout["n_rows"]

    # Batch tiling: single grid step at inference scale; 256-row "parallel"
    # tiles at training scale so v7x megacore can split the batch.
    tb = 256 if B >= 256 else _round_up(max(B, 8), 8)
    b_pad = _round_up(B, tb)

    xu = jnp.concatenate([x, u], axis=1)         # tiny fused XLA op
    xu = jnp.pad(xu, ((0, b_pad - B), (0, in_pad - in_dim)))

    kernel = functools.partial(
        _critic_kernel,
        in_pad=in_pad, r_w14=layout["r_w14"], r_b14=layout["r_b14"],
        r_w25=layout["r_w25"], r_b25=layout["r_b25"],
        r_w36=layout["r_w36"], r_b36=layout["r_b36"])

    flops = 2 * b_pad * (in_pad * H1T + H1T * H2T + H2T * H2T)
    bytes_accessed = 4 * (xu.size + slab.size + b_pad * 2)

    q = pl.pallas_call(
        kernel,
        out_shape=jax.ShapeDtypeStruct((b_pad, 2), jnp.float32),
        grid=(b_pad // tb,),
        in_specs=[
            pl.BlockSpec((tb, in_pad), lambda i: (i, 0)),
            pl.BlockSpec((n_rows, WSLAB), lambda i: (0, 0)),   # weights resident
        ],
        out_specs=pl.BlockSpec((tb, 2), lambda i: (i, 0)),
        compiler_params=pltpu.CompilerParams(
            dimension_semantics=("parallel",)),
        cost_estimate=pl.CostEstimate(flops=flops, transcendentals=0,
                                      bytes_accessed=bytes_accessed),
    )(xu, slab)

    return q[:B, 0:1], q[:B, 1:2]


def init_linear(key, in_features, out_features):
    """Deterministic PyTorch-style uniform init; weight stored as [in, out]."""
    kw, kb = jax.random.split(key)
    bound = 1.0 / np.sqrt(in_features)
    w = jax.random.uniform(kw, (in_features, out_features), jnp.float32, -bound, bound)
    b = jax.random.uniform(kb, (out_features,), jnp.float32, -bound, bound)
    return w, b


def reference_forward(x, u, params):
    hp = jax.lax.Precision.HIGHEST   # match the f32 kernel accumulation
    xu = jnp.concatenate([x, u], axis=1)
    (w1, b1), (w2, b2), (w3, b3), (w4, b4), (w5, b5), (w6, b6) = params
    h1 = jnp.maximum(jnp.dot(xu, w1, precision=hp) + b1, 0.0)
    h1 = jnp.maximum(jnp.dot(h1, w2, precision=hp) + b2, 0.0)
    q1 = jnp.dot(h1, w3, precision=hp) + b3
    h2 = jnp.maximum(jnp.dot(xu, w4, precision=hp) + b4, 0.0)
    h2 = jnp.maximum(jnp.dot(h2, w5, precision=hp) + b5, 0.0)
    q2 = jnp.dot(h2, w6, precision=hp) + b6
    return q1, q2


if __name__ == "__main__":
    state_dim, action_dim = 12, 4
    batch = 8
    in_dim = state_dim + action_dim

    key = jax.random.PRNGKey(0)
    keys = jax.random.split(key, 8)

    # layer_1 .. layer_6 of the PyTorch Critic
    params = [
        init_linear(keys[0], in_dim, 100),
        init_linear(keys[1], 100, 30),
        init_linear(keys[2], 30, 1),
        init_linear(keys[3], in_dim, 100),
        init_linear(keys[4], 100, 30),
        init_linear(keys[5], 30, 1),
    ]

    # Build the fused/padded parameter slab once.
    fused_slab, layout = fuse_critic_params(params, state_dim, action_dim)
    fused_slab = jax.block_until_ready(fused_slab)

    x = jax.random.normal(keys[6], (batch, state_dim), jnp.float32)
    u = jax.random.normal(keys[7], (batch, action_dim), jnp.float32)

    q1, q2 = critic_forward(x, u, (fused_slab, layout))
    q1 = jax.block_until_ready(q1)
    q2 = jax.block_until_ready(q2)

    r1, r2 = reference_forward(x, u, params)
    np.testing.assert_allclose(np.asarray(q1), np.asarray(r1), rtol=1e-4, atol=1e-4)
    np.testing.assert_allclose(np.asarray(q2), np.asarray(r2), rtol=1e-4, atol=1e-4)

    print("KERNEL_OK")
</pallas_src>

<mosaic_0001>
module attributes {stable_mosaic.version = 11 : i64} {
  func.func @_critic_kernel(%arg0: i32, %arg1: memref<8x16xf32, #tpu.memory_space<vmem>>, %arg2: memref<424x256xf32, #tpu.memory_space<vmem>>, %arg3: memref<8x2xf32, #tpu.memory_space<vmem>>) attributes {dimension_semantics = [#tpu.dimension_semantics<parallel>], iteration_bounds = array<i64: 1>, scalar_prefetch = 0 : i64, scratch_operands = 0 : i64, tpu.core_type = #tpu.core_type<tc>, window_params = [{transform_indices = @transform_0, window_bounds = array<i64: 8, 16>}, {pipeline_mode = #tpu.pipeline_mode<synchronous>, transform_indices = @transform_1, window_bounds = array<i64: 424, 256>}, {transform_indices = @transform_2, window_bounds = array<i64: 8, 2>}]} {
    %c0 = arith.constant 0 : index
    %c0_0 = arith.constant 0 : index
    %0 = vector.load %arg1[%c0, %c0_0] : memref<8x16xf32, #tpu.memory_space<vmem>>, vector<8x16xf32>
    %c0_1 = arith.constant 0 : index
    %c0_2 = arith.constant 0 : index
    %1 = vector.load %arg2[%c0_1, %c0_2] : memref<424x256xf32, #tpu.memory_space<vmem>>, vector<16x256xf32>
    %cst = arith.constant dense<0.000000e+00> : vector<8x256xf32>
    %2 = tpu.matmul %0, %1, %cst {dimension_numbers = #tpu.dot_dimension_numbers<[1], [0], [0], [1], [0, 0, 1, 1], [], []>} : vector<8x16xf32>, vector<16x256xf32>, vector<8x256xf32> -> vector<8x256xf32>
    %c16 = arith.constant 16 : index
    %c0_3 = arith.constant 0 : index
    %3 = vector.load %arg2[%c16, %c0_3] : memref<424x256xf32, #tpu.memory_space<vmem>>, vector<1x256xf32>
    %4 = vector.broadcast %3 : vector<1x256xf32> to vector<8x256xf32>
    %5 = arith.addf %2, %4 : vector<8x256xf32>
    %cst_4 = arith.constant 0.000000e+00 : f32
    %6 = vector.broadcast %cst_4 : f32 to vector<8x256xf32>
    %7 = arith.maximumf %5, %6 : vector<8x256xf32>
    %c24 = arith.constant 24 : index
    %c0_5 = arith.constant 0 : index
    %8 = vector.load %arg2[%c24, %c0_5] : memref<424x256xf32, #tpu.memory_space<vmem>>, vector<256x128xf32>
    %cst_6 = arith.constant dense<0.000000e+00> : vector<8x128xf32>
    %9 = tpu.matmul %7, %8, %cst_6 {dimension_numbers = #tpu.dot_dimension_numbers<[1], [0], [0], [1], [0, 0, 1, 1], [], []>} : vector<8x256xf32>, vector<256x128xf32>, vector<8x128xf32> -> vector<8x128xf32>
    %c280 = arith.constant 280 : index
    %c0_7 = arith.constant 0 : index
    %10 = vector.load %arg2[%c280, %c0_7] : memref<424x256xf32, #tpu.memory_space<vmem>>, vector<1x128xf32>
    %11 = vector.broadcast %10 : vector<1x128xf32> to vector<8x128xf32>
    %12 = arith.addf %9, %11 : vector<8x128xf32>
    %cst_8 = arith.constant 0.000000e+00 : f32
    %13 = vector.broadcast %cst_8 : f32 to vector<8x128xf32>
    %14 = arith.maximumf %12, %13 : vector<8x128xf32>
    %c288 = arith.constant 288 : index
    %c0_9 = arith.constant 0 : index
    %15 = vector.load %arg2[%c288, %c0_9] : memref<424x256xf32, #tpu.memory_space<vmem>>, vector<128x128xf32>
    %cst_10 = arith.constant dense<0.000000e+00> : vector<8x128xf32>
    %16 = tpu.matmul %14, %15, %cst_10 {dimension_numbers = #tpu.dot_dimension_numbers<[1], [0], [0], [1], [0, 0, 1, 1], [], []>} : vector<8x128xf32>, vector<128x128xf32>, vector<8x128xf32> -> vector<8x128xf32>
    %c416 = arith.constant 416 : index
    %c0_11 = arith.constant 0 : index
    %17 = vector.load %arg2[%c416, %c0_11] : memref<424x256xf32, #tpu.memory_space<vmem>>, vector<1x128xf32>
    %18 = vector.broadcast %17 : vector<1x128xf32> to vector<8x128xf32>
    %19 = arith.addf %16, %18 : vector<8x128xf32>
    %20 = vector.extract_strided_slice %19 {offsets = [0, 0], sizes = [8, 2], strides = [1, 1]} : vector<8x128xf32> to vector<8x2xf32>
    %c0_12 = arith.constant 0 : index
    %c0_13 = arith.constant 0 : index
    %21 = vector.load %arg3[%c0_12, %c0_13] : memref<8x2xf32, #tpu.memory_space<vmem>>, vector<8x2xf32>
    tpu.vector_store %arg3[%c0_12, %c0_13], %20 {strides = array<i32>} : memref<8x2xf32, #tpu.memory_space<vmem>>, vector<8x2xf32>,
    return
  }
  func.func @transform_0(%arg0: i32) -> (i32, i32) {
    %c0_i32 = arith.constant 0 : i32
    %c0_i32_0 = arith.constant 0 : i32
    return %arg0, %c0_i32 : i32, i32
  }
  func.func @transform_1(%arg0: i32) -> (i32, i32) {
    %c0_i32 = arith.constant 0 : i32
    %c0_i32_0 = arith.constant 0 : i32
    %c0_i32_1 = arith.constant 0 : i32
    return %c0_i32, %c0_i32_0 : i32, i32
  }
  func.func @transform_2(%arg0: i32) -> (i32, i32) {
    %c0_i32 = arith.constant 0 : i32
    %c0_i32_0 = arith.constant 0 : i32
    return %arg0, %c0_i32 : i32, i32
  }
}

</mosaic_0001>

<bundles_post_ra>
// kernel: tpu_custom_call.1
= control target key start
LH: loop header
LB: loop body
LE: loop exit
PB: predicated region body
PF: predicated region fallthrough
CT: control target
= control target key end

     0   :  { %7 = vsyncpa [#allocation3], 0  ;;  %s592_s0 = inlined_call_operand.hbm [shape: f32[8,16], index: 0, kind: input, shape index: {}]   ;;  %s593_s1 = inlined_call_operand.hbm [shape: f32[424,256], index: 1, kind: input, shape index: {}]   ;;  %s594_s2 = inlined_call_operand.vmem [shape: f32[8,2], index: 2, kind: output, shape index: {}]  }
   0x1   :  { %8 = vsyncpa [#allocation5], 0  ;;  %s534_s9 = smov [#allocation2]   ;;  %s535_s11 = smov [#allocation4]  }
   0x2   :  { %s15_s10 = sshll.u32 %s534_s9, 4  ;;  %s24_s12 = sshll.u32 %s535_s11, 4  ;;  %s16_s10 = int_to_ptr.vmem [resolvable:$true] %s15_s10  ;;  %s556_s12 = int_to_ptr.vmem [resolvable:$true] %s24_s12 }
   0x3   :  { %s486_s15 = scalar_lea.hbm %s592_s0, 128 }
   0x4   :  { %p487_p0 = scmp.ne.s32.totalorder %s592_s0, %s486_s15  ;;  %p490_p1 = scmp.lt.u32.totalorder %s486_s15, %s592_s0 }
   0x6   :  { %p492_p2 = pnand %p490_p1, %p487_p0 }
   0x8   :  { %495 = shalt.err (!%p492_p2)
}
   0x9   :  { %s496_s20 = scalar_lea.vmem %s16_s10, 128  ;;  %p501_p4 = scmp.lt.s32.totalorder %s16_s10, %s16_s10 }
   0xa   :  { %p497_p3 = scmp.ne.s32.totalorder %s16_s10, %s496_s20  ;;  %p502_p5 = scmp.lt.s32.totalorder %s496_s20, %s496_s20 }
   0xc   :  { %p503_p6 = por %p502_p5, %p501_p4 }
   0xe   :  { %p504_p7 = pnand %p503_p6, %p497_p3 }
  0x10   :  { %507 = shalt.err (!%p504_p7)
}
  0x11   :  { %18 = dma.hbm_to_vmem [thread:$0]  %s592_s0, 128, %s16_s10, [#allocation3]  }
  0x12   :  { %s508_s25 = scalar_lea.hbm %s593_s1, 13568 }
  0x13   :  { %p509_p8 = scmp.ne.s32.totalorder %s593_s1, %s508_s25  ;;  %p512_p9 = scmp.lt.u32.totalorder %s508_s25, %s593_s1 }
  0x15   :  { %p514_p10 = pnand %p512_p9, %p509_p8 }
  0x17   :  { %517 = shalt.err (!%p514_p10)
}
  0x18   :  { %s518_s30 = scalar_lea.vmem %s556_s12, 13568  ;;  %p523_p12 = scmp.lt.s32.totalorder %s556_s12, %s556_s12 }
  0x19   :  { %p519_p11 = scmp.ne.s32.totalorder %s556_s12, %s518_s30  ;;  %p524_p13 = scmp.lt.s32.totalorder %s518_s30, %s518_s30 }
  0x1b   :  { %p525_p0 = por %p524_p13, %p523_p12 }
  0x1d   :  { %p526_p1 = pnand %p525_p0, %p519_p11 }
  0x1f   :  { %529 = shalt.err (!%p526_p1)
}
  0x20   :  { %s536_s0 = smov 256   ;;  %s537_s3 = smov 16  }
  0x21   :  { %30 = dma.hbm_to_vmem [thread:$0]  %s593_s1, 13568, %s556_s12, [#allocation5], %s536_s0, %s536_s0, %s537_s3  }
  0x22   :  { %530 = dma.done.wait [#allocation3], 128  }
  0x23   :  { %531 = vsyncadd [#allocation3], 4294967168 }
  0x24   :  { %532 = dma.done.wait [#allocation5], 13568  }
  0x25   :  { %533 = vsyncadd [#allocation5], 4294953728  ;;  %v538_v0 = vmov 0.0   ;;  %v39_v1 = vld [vmem:[#allocation4 + $0x8] sm:$0xff]  ;;  %v41_v2 = vld [vmem:[#allocation4 + $0x18] sm:$0xff]  ;;  %vm55_vm0 = vcmask 130048  }
  0x26   :  { %123 = vmatprep.mubr.f32.mxu0 %v538_v0  ;;  %v38_v3 = vld [vmem:[#allocation4] sm:$0xff]  ;;  %v419_v4 = vpack.c.bf16 %v41_v2, %v39_v1  ;;  %v40_v5 = vld [vmem:[#allocation4 + $0x10] sm:$0xff]  ;;  %v37_v8 = vld [vmem:[#allocation2] sm:$0xff]  ;;  %v539_v59 = vmov 0.0|0.0   ;;  %vm540_vm1 = vmmov 0   ;;  %vm323_vm2 = vcmask 15360  }
  0x27   :  { %v148_v6 = vld [vmem:[#allocation4 + $0x130] sm:$0xff]  ;;  %v421_v7 = vpack.c.bf16 %v40_v5, %v38_v3  ;;  %v149_v9 = vld [vmem:[#allocation4 + $0x140] sm:$0xff] }
  0x28   :  { %v132_v10 = vld [vmem:[#allocation4 + $0x30] sm:$0xff]  ;;  %v133_v11 = vld [vmem:[#allocation4 + $0x40] sm:$0xff]  ;;  %420 = vmatprep.subr.bf16.mxu0 %v419_v4  ;;  %v423_v12 = vpack.c.bf16 %v149_v9, %v148_v6 }
  0x29   :  { %v425_v13 = vpack.c.bf16 %v133_v11, %v132_v10  ;;  %v150_v14 = vld [vmem:[#allocation4 + $0x150] sm:$0xff]  ;;  %v151_v15 = vld [vmem:[#allocation4 + $0x160] sm:$0xff]  ;;  %422 = vmatpush1.bf16.msra.mxu0 %v421_v7 }
  0x2a   :  { %v134_v16 = vld [vmem:[#allocation4 + $0x50] sm:$0xff]  ;;  %v427_v17 = vpack.c.bf16 %v151_v15, %v150_v14  ;;  %v135_v18 = vld [vmem:[#allocation4 + $0x60] sm:$0xff]  ;;  %424 = vmatprep.subr.bf16.mxu1 %v423_v12  ;;  %455 = vmatprep.subr.bf16.mxu0 %v539_v59  ;;  %v45_v12 = vlaneseq }
  0x2b   :  { %v152_v19 = vld [vmem:[#allocation4 + $0x170] sm:$0xff]  ;;  %v153_v20 = vld [vmem:[#allocation4 + $0x180] sm:$0xff]  ;;  %426 = vmatpush3.bf16.msra.mxu1 %v425_v13  ;;  %v429_v21 = vpack.c.bf16 %v135_v18, %v134_v16 }
  0x2c   :  { %331 = vmatmul.mubr.msk.f32.vlgmr.msra.gmra.mrb[0].mxu0 %vm55_vm0, %v37_v8  ;;  %428 = vmatprep.subr.bf16.mxu1 %v427_v17  ;;  %v431_v22 = vpack.c.bf16 %v153_v20, %v152_v19  ;;  %v136_v23 = vld [vmem:[#allocation4 + $0x70] sm:$0xff]  ;;  %v137_v24 = vld [vmem:[#allocation4 + $0x80] sm:$0xff]  ;;  %v46_v13 = vshrl.u32 %v45_v12, 7 }
  0x2d   :  { %v154_v25 = vld [vmem:[#allocation4 + $0x190] sm:$0xff]  ;;  %v155_v26 = vld [vmem:[#allocation4 + $0x1a0] sm:$0xff]  ;;  %v433_v27 = vpack.c.bf16 %v137_v24, %v136_v23  ;;  %416 = vmatprep.mubr.msk.f32.mxu0 %vm540_vm1, %v538_v0 }
  0x2e   :  { %v435_v28 = vpack.c.bf16 %v155_v26, %v154_v25  ;;  %v138_v29 = vld [vmem:[#allocation4 + $0x90] sm:$0xff]  ;;  %v139_v30 = vld [vmem:[#allocation4 + $0xa0] sm:$0xff]  ;;  %v47_v14 = vsub.s32 0, %v46_v13  ;;  %v51_v16 = vsub.s32 1, %v46_v13 }
  0x2f   :  { %430 = vmatpush3.bf16.msra.mxu1 %v429_v21  ;;  %v156_v31 = vld [vmem:[#allocation4 + $0x1b0] sm:$0xff]  ;;  %v157_v32 = vld [vmem:[#allocation4 + $0x1c0] sm:$0xff]  ;;  %v437_v33 = vpack.c.bf16 %v139_v30, %v138_v29 }
  0x30   :  { %432 = vmatprep.subr.bf16.mxu1 %v431_v22  ;;  %v439_v34 = vpack.c.bf16 %v157_v32, %v156_v31  ;;  %v140_v35 = vld [vmem:[#allocation4 + $0xb0] sm:$0xff]  ;;  %v141_v36 = vld [vmem:[#allocation4 + $0xc0] sm:$0xff] }
  0x31   :  { %v158_v37 = vld [vmem:[#allocation4 + $0x1d0] sm:$0xff]  ;;  %v159_v38 = vld [vmem:[#allocation4 + $0x1e0] sm:$0xff]  ;;  %v441_v39 = vpack.c.bf16 %v141_v36, %v140_v35 }
  0x32   :  { %v443_v40 = vpack.c.bf16 %v159_v38, %v158_v37  ;;  %v142_v41 = vld [vmem:[#allocation4 + $0xd0] sm:$0xff]  ;;  %v143_v42 = vld [vmem:[#allocation4 + $0xe0] sm:$0xff] }
  0x33   :  { %434 = vmatpush3.bf16.msra.mxu1 %v433_v27  ;;  %v160_v43 = vld [vmem:[#allocation4 + $0x1f0] sm:$0xff]  ;;  %v161_v44 = vld [vmem:[#allocation4 + $0x200] sm:$0xff]  ;;  %v445_v45 = vpack.c.bf16 %v143_v42, %v142_v41 }
  0x34   :  { %436 = vmatprep.subr.bf16.mxu1 %v435_v28  ;;  %v447_v46 = vpack.c.bf16 %v161_v44, %v160_v43  ;;  %v144_v47 = vld [vmem:[#allocation4 + $0xf0] sm:$0xff]  ;;  %v145_v48 = vld [vmem:[#allocation4 + $0x100] sm:$0xff] }
  0x35   :  { %v449_v49 = vpack.c.bf16 %v145_v48, %v144_v47  ;;  %v162_v50 = vld [vmem:[#allocation4 + $0x210] sm:$0xff]  ;;  %v163_v51 = vld [vmem:[#allocation4 + $0x220] sm:$0xff] }
  0x36   :  { %v451_v52 = vpack.c.bf16 %v163_v51, %v162_v50  ;;  %v146_v53 = vld [vmem:[#allocation4 + $0x110] sm:$0xff]  ;;  %v147_v54 = vld [vmem:[#allocation4 + $0x120] sm:$0xff] }
  0x37   :  { %438 = vmatpush3.bf16.msra.mxu1 %v437_v33  ;;  %v453_v55 = vpack.c.bf16 %v147_v54, %v146_v53  ;;  %v236_v56 = vld [vmem:[#allocation4 + $0x240] sm:$0xff]  ;;  %v237_v57 = vld [vmem:[#allocation4 + $0x250] sm:$0xff] }
  0x38   :  { %440 = vmatprep.subr.bf16.mxu1 %v439_v34  ;;  %v238_v58 = vld [vmem:[#allocation4 + $0x260] sm:$0xff]  ;;  %v456_v60 = vpack.c.bf16 %v237_v57, %v236_v56  ;;  %v239_v61 = vld [vmem:[#allocation4 + $0x270] sm:$0xff] }
  0x39   :  { %v459_v62 = vpack.c.bf16 %v239_v61, %v238_v58  ;;  %v240_v63 = vld [vmem:[#allocation4 + $0x280] sm:$0xff]  ;;  %v241_v1 = vld [vmem:[#allocation4 + $0x290] sm:$0xff] }
  0x3a   :  { %457 = vmatpush3.bf16.msra.mxu0 %v456_v60  ;;  %v462_v2 = vpack.c.bf16 %v241_v1, %v240_v63  ;;  %v242_v3 = vld [vmem:[#allocation4 + $0x2a0] sm:$0xff]  ;;  %v243_v4 = vld [vmem:[#allocation4 + $0x2b0] sm:$0xff] }
  0x3b   :  { %442 = vmatpush3.bf16.msra.mxu1 %v441_v39  ;;  %458 = vmatprep.subr.bf16.mxu0 %v539_v59  ;;  %v465_v5 = vpack.c.bf16 %v243_v4, %v242_v3  ;;  %v244_v6 = vld [vmem:[#allocation4 + $0x2c0] sm:$0xff]  ;;  %v245_v7 = vld [vmem:[#allocation4 + $0x2d0] sm:$0xff] }
  0x3c   :  { %444 = vmatprep.subr.bf16.mxu1 %v443_v40  ;;  %v468_v8 = vpack.c.bf16 %v245_v7, %v244_v6  ;;  %v246_v9 = vld [vmem:[#allocation4 + $0x2e0] sm:$0xff]  ;;  %v247_v10 = vld [vmem:[#allocation4 + $0x2f0] sm:$0xff] }
  0x3d   :  { %v471_v11 = vpack.c.bf16 %v247_v10, %v246_v9  ;;  %v43_v15 = vld [vmem:[#allocation4 + $0x20] ss:$8 sm:$0x3]  ;;  %v249_v26 = vld [vmem:[#allocation4 + $0x310] sm:$0xff] }
  0x3e   :  { %460 = vmatpush3.bf16.msra.mxu0 %v459_v62  ;;  %v48_v17 = vrot.slane %v43_v15, %v47_v14  ;;  %v52_v18 = vrot.slane %v43_v15, %v51_v16  ;;  %v248_v25 = vld [vmem:[#allocation4 + $0x300] sm:$0xff]  ;;  %v251_v29 = vld [vmem:[#allocation4 + $0x330] sm:$0xff] }
  0x3f   :  { %446 = vmatpush3.bf16.msra.mxu1 %v445_v45  ;;  %461 = vmatprep.subr.bf16.mxu0 %v539_v59  ;;  %v474_v27 = vpack.c.bf16 %v249_v26, %v248_v25  ;;  %v250_v28 = vld [vmem:[#allocation4 + $0x320] sm:$0xff]  ;;  %v164_v32 = vld [vmem:[#allocation4 + $0x230] ss:$0 sm:$0xff] }
  0x40   :  { %448 = vmatprep.subr.bf16.mxu1 %v447_v46  ;;  %v477_v30 = vpack.c.bf16 %v251_v29, %v250_v28  ;;  %v252_v37 = vld [vmem:[#allocation4 + $0x340] ss:$0 sm:$0xff] }
  0x42   :  { %463 = vmatpush3.bf16.msra.mxu0 %v462_v2 }
  0x43   :  { %450 = vmatpush3.bf16.msra.mxu1 %v449_v49  ;;  %464 = vmatprep.subr.bf16.mxu0 %v539_v59 }
  0x44   :  { %452 = vmatprep.subr.bf16.mxu1 %v451_v52 }
  0x46   :  { %466 = vmatpush3.bf16.msra.mxu0 %v465_v5 }
  0x47   :  { %454 = vmatpush3.bf16.msra.mxu1 %v453_v55  ;;  %467 = vmatprep.subr.bf16.mxu0 %v539_v59 }
  0x4a   :  { %469 = vmatpush3.bf16.msra.mxu0 %v468_v8 }
  0x4b   :  { %470 = vmatprep.subr.bf16.mxu0 %v539_v59 }
  0x4e   :  { %472 = vmatpush3.bf16.msra.mxu0 %v471_v11 }
  0x4f   :  { %473 = vmatprep.subr.bf16.mxu0 %v539_v59 }
  0x52   :  { %475 = vmatpush3.bf16.msra.mxu0 %v474_v27 }
  0x53   :  { %476 = vmatprep.subr.bf16.mxu0 %v539_v59 }
  0x56   :  { %478 = vmatpush3.bf16.msra.mxu0 %v477_v30 }
  0xff   :  { %v125_v19 = vpop.f32.mrb[0].mxu0 }
 0x100   :  { %v126_v20 = vadd.f32 %v125_v19, %v48_v17  ;;  %v127_v21 = vpop.f32.mrb[1].mxu0 }
 0x101   :  { %v128_v22 = vadd.f32 %v127_v21, %v52_v18 }
 0x102   :  { %v130_v24 = vmax.f32 %v126_v20, 0.0 }
 0x103   :  { %v131_v23 = vmax.f32 %v128_v22, 0.0 }
 0x105   :  { %229 = vmatprep.mubr.f32.mxu1 %v131_v23 }
 0x106   :  { %230 = vmatmul.mubr.f32.vlgmr.msra.gmra.mrb[0].mxu1 %v130_v24 }
 0x1d9   :  { %v364_v31 = vpop.f32.mrb[0].mxu1 }
 0x1da   :  { %v365_v33 = vpop.f32.mrb[1].mxu1 }
 0x1db   :  { %v366_v34 = vadd.f32 %v365_v33, %v364_v31 }
 0x1dd   :  { %v232_v35 = vadd.f32 %v366_v34, %v164_v32 }
 0x1df   :  { %v235_v36 = vmax.f32 %v232_v35, 0.0 }
 0x1e1   :  { %417 = vmatmul.mubr.f32.vlgmr.msra.gmra.mrb[2].mxu0 %v235_v36 }
 0x2b4   :  { %v319_v38 = vpop.f32.mrb[2].mxu0 }
 0x2b5   :  { %v320_v39 = vadd.f32 %v319_v38, %v252_v37  ;;  %v418_v40 = vpop.f32.mrb[3].mxu0 }
 0x2b7   :  { %324 = vst.msk [vmem:[%s594_s2] sm:$0xff] %vm323_vm2, %v320_v39 }
 0x2b8   :  { %329 = vsyncpa [#allocation3], 1 }
 0x2b9   :  { %330 = vsyncpa [#allocation5], 1 }

</bundles_post_ra>
